<compile_context>
chip_gen: v7x
topology: tpu7x:2x2x1
jax: 0.10.0
libtpu: 0.0.40
codegen_flags: <defaults>
</compile_context>

<pallas_src>
import functools

import numpy as np
import jax
import jax.numpy as jnp
from jax.experimental import pallas as pl
from jax.experimental.pallas import tpu as pltpu


def _round_up(x, m):
    return (x + m - 1) // m * m


def _scst_kernel(tgt_ref, inp_ref, lsum_ref, cnt_ref, *, b_real, l_real, v_tile):
    """One (batch tile, vocab tile) step.

    tgt_ref : (bt, Lp, 1)      int32  shifted target ids (tgt[b, t] = target[b, t-1])
    inp_ref : (bt, Lp, v_tile) f32    log-softmax slice over the vocab tile
    lsum_ref, cnt_ref : (1, 8, 128) f32  per-batch-tile partial sums
                        (lsum accumulated across vocab tiles, cnt written once)
    """
    v = pl.program_id(1)

    tgt = tgt_ref[...]
    bt, lp, _ = tgt.shape

    # --- validity + "strictly before the 2nd zero target id" mask (VPU/XLU only)
    big = jnp.float32(2 * lp)
    t_ids = jax.lax.broadcasted_iota(jnp.int32, (bt, lp, 1), 1)
    t_valid = (t_ids >= 1) & (t_ids < l_real)         # loop runs t = 1 .. L-1
    t_pos = t_ids.astype(jnp.float32)

    row0 = pl.program_id(0) * bt                      # batch padding rows
    r_ids = jax.lax.broadcasted_iota(jnp.int32, (bt, lp, 1), 0) + row0
    r_valid = r_ids < b_real

    is_zero = (tgt == 0) & t_valid
    p1 = jnp.min(jnp.where(is_zero, t_pos, big), axis=1, keepdims=True)
    p2 = jnp.min(jnp.where(is_zero & (t_pos > p1), t_pos, big), axis=1,
                 keepdims=True)
    mask = t_valid & r_valid & (t_pos < p2)           # (bt, Lp, 1) bool

    # --- init the resident accumulator + write the token count (first vocab tile)
    @pl.when(v == 0)
    def _():
        lsum_ref[...] = jnp.zeros_like(lsum_ref)
        count = jnp.sum(mask.astype(jnp.float32))
        cnt_ref[...] = jnp.full(cnt_ref.shape, count, jnp.float32)

    # --- masked one-hot gather over this vocab tile, fused with the reduction
    inp = inp_ref[...]                                # (bt, Lp, v_tile) f32
    v_ids = jax.lax.broadcasted_iota(jnp.int32, inp.shape, 2) + v * v_tile
    sel = (v_ids == tgt) & mask
    neg_sum = -jnp.sum(jnp.where(sel, inp, 0.0))

    lsum_ref[...] = lsum_ref[...] + neg_sum


def scst_loss_pallas(logprobs, target, reward, reward1, *,
                     b_tile=None, v_tile_max=2048):
    """Pallas implementation of SCSTCriterion.forward.

    logprobs : (B, L, Mp1) f32 -- `input` in the PyTorch module (log-softmax)
    target   : (B, seq_length) int32
    reward, reward1 : scalars (CIDEr scores, computed outside -- see TODO)
    Returns (loss, reward, reward1) like the PyTorch module.
    """
    logprobs = jnp.asarray(logprobs, jnp.float32)
    target = jnp.asarray(target, jnp.int32)
    B, L, Mp1 = logprobs.shape
    seq_length = target.shape[1]

    # target_index[b, t] = target[b, t-1] if t-1 < seq_length else 0  (t=0 unused)
    ncopy = min(L - 1, seq_length)
    tgt_idx = jnp.zeros((B, L), jnp.int32)
    if ncopy > 0:
        tgt_idx = tgt_idx.at[:, 1:1 + ncopy].set(target[:, :ncopy])

    # tile sizes: batch tile <= 8 (leading dim, no alignment constraint),
    # vocab tile lane-dense and capped so VMEM blocks stay small for big vocabs
    if b_tile is None:
        b_tile = max(1, min(B, 8))
    v_tile = _round_up(Mp1, 128) if Mp1 <= v_tile_max else v_tile_max

    b_pad = _round_up(B, b_tile)
    l_pad = _round_up(L, 8)
    m_pad = _round_up(Mp1, v_tile)

    inp_p = jnp.pad(logprobs, ((0, b_pad - B), (0, l_pad - L), (0, m_pad - Mp1)))
    tgt_p = jnp.pad(tgt_idx, ((0, b_pad - B), (0, l_pad - L)))[:, :, None]

    nb = b_pad // b_tile
    nv = m_pad // v_tile
    kernel = functools.partial(_scst_kernel, b_real=B, l_real=L, v_tile=v_tile)

    lsum, cnt = pl.pallas_call(
        kernel,
        grid=(nb, nv),
        in_specs=[
            pl.BlockSpec((b_tile, l_pad, 1), lambda i, v: (i, 0, 0)),
            pl.BlockSpec((b_tile, l_pad, v_tile), lambda i, v: (i, 0, v)),
        ],
        out_specs=(
            pl.BlockSpec((1, 8, 128), lambda i, v: (i, 0, 0)),
            pl.BlockSpec((1, 8, 128), lambda i, v: (i, 0, 0)),
        ),
        out_shape=(
            jax.ShapeDtypeStruct((nb, 8, 128), jnp.float32),
            jax.ShapeDtypeStruct((nb, 8, 128), jnp.float32),
        ),
        compiler_params=pltpu.CompilerParams(
            dimension_semantics=("parallel", "arbitrary"),
            vmem_limit_bytes=32 * 1024 * 1024,
        ),
    )(tgt_p, inp_p)

    loss_sum = jnp.sum(lsum[:, 0, 0])
    n = jnp.sum(cnt[:, 0, 0])
    reward_diff = jnp.maximum(
        jnp.asarray(reward, jnp.float32) - jnp.asarray(reward1, jnp.float32),
        jnp.float32(1.0))
    loss = loss_sum / n * reward_diff
    return loss, reward, reward1


class SCSTCriterionJAX:
    """Mirrors SCSTCriterion.forward; the hot path runs in the Pallas kernel."""

    def forward(self, input, input1, seq, seq1, target, vocab,
                reward=None, reward1=None):
        # TODO(synk): utils.decode_sequence / utils.get_reward('CIDEr') are text
        # metrics with no Pallas equivalent; reward / reward1 are supplied.
        del input1, seq, seq1, vocab
        return scst_loss_pallas(input, target, reward, reward1)

    __call__ = forward


def _scst_reference(logprobs, target, reward, reward1):
    """Exact numpy port of the PyTorch double loop."""
    inp = np.asarray(logprobs, np.float64)
    tgt = np.asarray(target)
    B, L, _ = inp.shape
    seq_length = tgt.shape[1]
    loss = 0.0
    n = 0
    for b in range(B):
        first_time = True
        for t in range(1, L):
            ti = 0 if (t - 1) >= seq_length else int(tgt[b, t - 1])
            if ti == 0 and first_time:
                first_time = False
            elif ti == 0 and (not first_time):
                break
            loss -= inp[b, t, ti]
            n += 1
    loss /= n
    rd = reward - reward1
    if rd < 1:
        rd = 1.0
    return loss * rd


if __name__ == "__main__":
    B, L, seq_length, Mp1 = 2, 10, 8, 32
    key = jax.random.PRNGKey(0)
    k1, k2 = jax.random.split(key)

    # log-softmax-like inputs (negative log-probs)
    logprobs = -jax.random.uniform(k1, (B, L, Mp1), jnp.float32, 0.05, 4.0)

    # targets with zeros placed so both rows exercise the "second zero" stop
    target = jax.random.randint(k2, (B, seq_length), 1, Mp1, dtype=jnp.int32)
    target = target.at[0, 3].set(0)   # row 0: two zeros -> stops before the 2nd
    target = target.at[0, 5].set(0)
    target = target.at[1, 6].set(0)   # row 1: one real zero + padding zero at the end

    reward, reward1 = 2.5, 0.75       # TODO(synk): CIDEr scores computed off-device

    crit = SCSTCriterionJAX()
    loss, r, r1 = crit(logprobs, None, None, None, target, None,
                       reward=reward, reward1=reward1)
    loss = jax.block_until_ready(loss)

    ref = _scst_reference(logprobs, target, reward, reward1)
    assert np.allclose(float(loss), float(ref), rtol=1e-5, atol=1e-5), \
        (float(loss), float(ref))

    print("KERNEL_OK")
</pallas_src>

<mosaic_0001>
module attributes {stable_mosaic.version = 11 : i64} {
  func.func @_scst_kernel(%arg0: i32, %arg1: i32, %arg2: memref<2x16x1xi32, #tpu.memory_space<vmem>>, %arg3: memref<2x16x128xf32, #tpu.memory_space<vmem>>, %arg4: memref<1x8x128xf32, #tpu.memory_space<vmem>>, %arg5: memref<1x8x128xf32, #tpu.memory_space<vmem>>) attributes {dimension_semantics = [#tpu.dimension_semantics<parallel>, #tpu.dimension_semantics<arbitrary>], iteration_bounds = array<i64: 1, 1>, scalar_prefetch = 0 : i64, scratch_operands = 0 : i64, tpu.core_type = #tpu.core_type<tc>, window_params = [{transform_indices = @transform_0, window_bounds = array<i64: 2, 16, 1>}, {transform_indices = @transform_1, window_bounds = array<i64: 2, 16, 128>}, {transform_indices = @transform_2, window_bounds = array<i64: 1, 8, 128>}, {transform_indices = @transform_3, window_bounds = array<i64: 1, 8, 128>}]} {
    %c0 = arith.constant 0 : index
    %c0_0 = arith.constant 0 : index
    %c0_1 = arith.constant 0 : index
    %0 = vector.load %arg2[%c0, %c0_0, %c0_1] : memref<2x16x1xi32, #tpu.memory_space<vmem>>, vector<2x16x1xi32>
    %1 = tpu.iota {dimensions = array<i32: 1>} : vector<2x16x1xi32>
    %c1_i32 = arith.constant 1 : i32
    %2 = vector.broadcast %c1_i32 : i32 to vector<2x16x1xi32>
    %3 = arith.cmpi sge, %1, %2 : vector<2x16x1xi32>
    %c10_i32 = arith.constant 10 : i32
    %4 = vector.broadcast %c10_i32 : i32 to vector<2x16x1xi32>
    %5 = arith.cmpi slt, %1, %4 : vector<2x16x1xi32>
    %6 = arith.andi %3, %5 : vector<2x16x1xi1>
    %7 = arith.sitofp %1 : vector<2x16x1xi32> to vector<2x16x1xf32>
    %c2_i32 = arith.constant 2 : i32
    %8 = arith.muli %arg0, %c2_i32 : i32
    %9 = tpu.iota {dimensions = array<i32: 0>} : vector<2x16x1xi32>
    %10 = vector.broadcast %8 : i32 to vector<2x16x1xi32>
    %11 = arith.addi %9, %10 : vector<2x16x1xi32>
    %c2_i32_2 = arith.constant 2 : i32
    %12 = vector.broadcast %c2_i32_2 : i32 to vector<2x16x1xi32>
    %13 = arith.cmpi slt, %11, %12 : vector<2x16x1xi32>
    %c0_i32 = arith.constant 0 : i32
    %14 = vector.broadcast %c0_i32 : i32 to vector<2x16x1xi32>
    %15 = arith.cmpi eq, %0, %14 : vector<2x16x1xi32>
    %16 = arith.andi %15, %6 : vector<2x16x1xi1>
    %cst = arith.constant 3.200000e+01 : f32
    %17 = vector.broadcast %cst : f32 to vector<2x16x1xf32>
    %18 = arith.select %16, %7, %17 : vector<2x16x1xi1>, vector<2x16x1xf32>
    %cst_3 = arith.constant dense<0x7F800000> : vector<2x1xf32>
    %19 = vector.multi_reduction <minimumf>, %18, %cst_3 [1] : vector<2x16x1xf32> to vector<2x1xf32>
    %20 = vector.shape_cast %19 : vector<2x1xf32> to vector<2x1x1xf32>
    %21 = vector.broadcast %20 : vector<2x1x1xf32> to vector<2x16x1xf32>
    %22 = arith.cmpf ogt, %7, %21 : vector<2x16x1xf32>
    %23 = arith.andi %16, %22 : vector<2x16x1xi1>
    %cst_4 = arith.constant 3.200000e+01 : f32
    %24 = vector.broadcast %cst_4 : f32 to vector<2x16x1xf32>
    %25 = arith.select %23, %7, %24 : vector<2x16x1xi1>, vector<2x16x1xf32>
    %cst_5 = arith.constant dense<0x7F800000> : vector<2x1xf32>
    %26 = vector.multi_reduction <minimumf>, %25, %cst_5 [1] : vector<2x16x1xf32> to vector<2x1xf32>
    %27 = vector.shape_cast %26 : vector<2x1xf32> to vector<2x1x1xf32>
    %28 = arith.andi %6, %13 : vector<2x16x1xi1>
    %29 = vector.broadcast %27 : vector<2x1x1xf32> to vector<2x16x1xf32>
    %30 = arith.cmpf olt, %7, %29 : vector<2x16x1xf32>
    %31 = arith.andi %28, %30 : vector<2x16x1xi1>
    %c0_i32_6 = arith.constant 0 : i32
    %32 = arith.cmpi eq, %arg1, %c0_i32_6 : i32
    %33 = arith.extui %32 : i1 to i32
    %c0_i32_7 = arith.constant 0 : i32
    %34 = arith.cmpi ne, %33, %c0_i32_7 : i32
    scf.if %34 {
      %cst_20 = arith.constant 0.000000e+00 : f32
      %55 = vector.broadcast %cst_20 : f32 to vector<1x8x128xf32>
      %c0_21 = arith.constant 0 : index
      %c0_22 = arith.constant 0 : index
      %c0_23 = arith.constant 0 : index
      %56 = vector.load %arg4[%c0_21, %c0_22, %c0_23] : memref<1x8x128xf32, #tpu.memory_space<vmem>>, vector<1x8x128xf32>
      tpu.vector_store %arg4[%c0_21, %c0_22, %c0_23], %55 {strides = array<i32>} : memref<1x8x128xf32, #tpu.memory_space<vmem>>, vector<1x8x128xf32>,
      %57 = arith.extui %31 : vector<2x16x1xi1> to vector<2x16x1xi32>
      %58 = arith.sitofp %57 : vector<2x16x1xi32> to vector<2x16x1xf32>
      %59 = vector.shape_cast %58 : vector<2x16x1xf32> to vector<1x2x16x1xf32>
      %cst_24 = arith.constant dense<0.000000e+00> : vector<1xf32>
      %60 = vector.multi_reduction <add>, %59, %cst_24 [1, 2, 3] : vector<1x2x16x1xf32> to vector<1xf32>
      %61 = vector.shape_cast %60 : vector<1xf32> to vector<1x1x1x1xf32>
      %62 = vector.extract %61[0, 0, 0, 0] : f32 from vector<1x1x1x1xf32>
      %63 = vector.broadcast %62 : f32 to vector<1x8x128xf32>
      %c0_25 = arith.constant 0 : index
      %c0_26 = arith.constant 0 : index
      %c0_27 = arith.constant 0 : index
      %64 = vector.load %arg5[%c0_25, %c0_26, %c0_27] : memref<1x8x128xf32, #tpu.memory_space<vmem>>, vector<1x8x128xf32>
      tpu.vector_store %arg5[%c0_25, %c0_26, %c0_27], %63 {strides = array<i32>} : memref<1x8x128xf32, #tpu.memory_space<vmem>>, vector<1x8x128xf32>,
    } else {
    }
    %c0_8 = arith.constant 0 : index
    %c0_9 = arith.constant 0 : index
    %c0_10 = arith.constant 0 : index
    %35 = vector.load %arg3[%c0_8, %c0_9, %c0_10] : memref<2x16x128xf32, #tpu.memory_space<vmem>>, vector<2x16x128xf32>
    %36 = tpu.iota {dimensions = array<i32: 2>} : vector<2x16x128xi32>
    %c128_i32 = arith.constant 128 : i32
    %37 = arith.muli %arg1, %c128_i32 : i32
    %38 = vector.broadcast %37 : i32 to vector<2x16x128xi32>
    %39 = arith.addi %36, %38 : vector<2x16x128xi32>
    %40 = vector.broadcast %0 : vector<2x16x1xi32> to vector<2x16x128xi32>
    %41 = arith.cmpi eq, %39, %40 : vector<2x16x128xi32>
    %42 = vector.broadcast %31 : vector<2x16x1xi1> to vector<2x16x128xi1>
    %43 = arith.andi %41, %42 : vector<2x16x128xi1>
    %cst_11 = arith.constant 0.000000e+00 : f32
    %44 = vector.broadcast %cst_11 : f32 to vector<2x16x128xf32>
    %45 = arith.select %43, %35, %44 : vector<2x16x128xi1>, vector<2x16x128xf32>
    %46 = vector.shape_cast %45 : vector<2x16x128xf32> to vector<1x2x16x128xf32>
    %cst_12 = arith.constant dense<0.000000e+00> : vector<1xf32>
    %47 = vector.multi_reduction <add>, %46, %cst_12 [1, 2, 3] : vector<1x2x16x128xf32> to vector<1xf32>
    %48 = vector.shape_cast %47 : vector<1xf32> to vector<1x1x1x1xf32>
    %49 = vector.extract %48[0, 0, 0, 0] : f32 from vector<1x1x1x1xf32>
    %cst_13 = arith.constant 0.000000e+00 : f32
    %50 = arith.subf %cst_13, %49 : f32
    %c0_14 = arith.constant 0 : index
    %c0_15 = arith.constant 0 : index
    %c0_16 = arith.constant 0 : index
    %51 = vector.load %arg4[%c0_14, %c0_15, %c0_16] : memref<1x8x128xf32, #tpu.memory_space<vmem>>, vector<1x8x128xf32>
    %52 = vector.broadcast %50 : f32 to vector<1x8x128xf32>
    %53 = arith.addf %51, %52 : vector<1x8x128xf32>
    %c0_17 = arith.constant 0 : index
    %c0_18 = arith.constant 0 : index
    %c0_19 = arith.constant 0 : index
    %54 = vector.load %arg4[%c0_17, %c0_18, %c0_19] : memref<1x8x128xf32, #tpu.memory_space<vmem>>, vector<1x8x128xf32>
    tpu.vector_store %arg4[%c0_17, %c0_18, %c0_19], %53 {strides = array<i32>} : memref<1x8x128xf32, #tpu.memory_space<vmem>>, vector<1x8x128xf32>,
    return
  }
  func.func @transform_0(%arg0: i32, %arg1: i32) -> (i32, i32, i32) {
    %c0_i32 = arith.constant 0 : i32
    %c0_i32_0 = arith.constant 0 : i32
    %c0_i32_1 = arith.constant 0 : i32
    return %arg0, %c0_i32, %c0_i32_0 : i32, i32, i32
  }
  func.func @transform_1(%arg0: i32, %arg1: i32) -> (i32, i32, i32) {
    %c0_i32 = arith.constant 0 : i32
    %c0_i32_0 = arith.constant 0 : i32
    return %arg0, %c0_i32, %arg1 : i32, i32, i32
  }
  func.func @transform_2(%arg0: i32, %arg1: i32) -> (i32, i32, i32) {
    %c0_i32 = arith.constant 0 : i32
    %c0_i32_0 = arith.constant 0 : i32
    %c0_i32_1 = arith.constant 0 : i32
    return %arg0, %c0_i32, %c0_i32_0 : i32, i32, i32
  }
  func.func @transform_3(%arg0: i32, %arg1: i32) -> (i32, i32, i32) {
    %c0_i32 = arith.constant 0 : i32
    %c0_i32_0 = arith.constant 0 : i32
    %c0_i32_1 = arith.constant 0 : i32
    return %arg0, %c0_i32, %c0_i32_0 : i32, i32, i32
  }
}

</mosaic_0001>

<bundles_post_ra>
// kernel: tpu_custom_call.1
= control target key start
LH: loop header
LB: loop body
LE: loop exit
PB: predicated region body
PF: predicated region fallthrough
CT: control target
= control target key end

     0   :  { %9 = vsyncpa [#allocation3], 0  ;;  %v19_v1 = vlaneseq  ;;  %v299_v3 = vmov 0   ;;  %s468_s0 = inlined_call_operand.vmem [shape: s32[2,16,1], index: 0, kind: input, shape index: {}]   ;;  %s469_s1 = inlined_call_operand.vmem [shape: f32[2,16,128], index: 1, kind: input, shape index: {}]   ;;  %s470_s2 = inlined_call_operand.hbm [shape: f32[1,8,128], index: 2, kind: output, shape index: {0}]   ;;  %s471_s3 = inlined_call_operand.hbm [shape: f32[1,8,128], index: 3, kind: output, shape index: {1}]  }
   0x1   :  { %v15_v0 = vld [vmem:[%s468_s0] sm:$0xff]  ;;  %v17_v2 = vld [vmem:[%s468_s0 + $0x10] sm:$0xff]  ;;  %249 = vset.pattern.permute.xlu0 %v299_v3  ;;  %v16_v4 = vld [vmem:[%s468_s0 + $0x8] sm:$0xff]  ;;  %250 = vset.pattern.permute.xlu1 %v299_v3 }
   0x2   :  { %10 = vsyncpa [#allocation5], 0  ;;  %v335_v5 = vshrl.u32 %v19_v1, 7  ;;  %149 = vperm.xlu0 %249, %v15_v0   ;;  %vm35_vm0 = vcmp.eq.s32.totalorder %v15_v0, 0  ;;  %v18_v6 = vld [vmem:[%s468_s0 + $0x18] sm:$0xff]  ;;  %vm47_vm1 = vcmask 7168  }
   0x3   :  { %vm37_vm2 = vcmp.eq.s32.totalorder %v17_v2, 0  ;;  %vm36_vm4 = vcmp.eq.s32.totalorder %v16_v4, 0  ;;  %vm38_vm6 = vcmp.eq.s32.totalorder %v18_v6, 0  ;;  %v300_v59 = vmov 0.0   ;;  %v140_v18 = vld [vmem:[%s469_s1 + $0x8] sm:$0xff]  ;;  %s301_s28 = smov [#allocation4]  }
   0x4   :  { %vm22_vm3 = vcmp.ge.s32.totalorder %v335_v5, 1  ;;  %v342_v7 = vcvt.s32.f32 %v335_v5  ;;  %v345_v8 = vadd.s32 8, %v335_v5 }
   0x5   :  { %vm349_vm5 = vmand %vm35_vm0, %vm22_vm3 }
   0x6   :  { %v43_v10 = vsel %vm349_vm5, %v342_v7, 32.0  ;;  %vm25_vm7 = vcmp.lt.s32.totalorder %v345_v8, 10  ;;  %v358_v11 = vcvt.s32.f32 %v345_v8  ;;  %152 = vperm.xlu0 %249, %v16_v4   ;;  %vm362_vm8 = vmand %vm37_vm2, %vm22_vm3 }
   0x7   :  { %v48_v13 = vsel %vm47_vm1, %v43_v10, inf  ;;  %vm369_vm9 = vmand %vm36_vm4, %vm25_vm7  ;;  %v45_v15 = vsel %vm362_vm8, %v342_v7, 32.0 }
   0x8   :  { %v44_v16 = vsel %vm369_vm9, %v358_v11, 32.0  ;;  %v57_v17 = vsel %vm47_vm1, %v45_v15, inf  ;;  %vm382_vm10 = vmand %vm38_vm6, %vm25_vm7 }
   0x9   :  { %v49_v19 = vsel %vm47_vm1, %v44_v16, inf  ;;  %v46_v20 = vsel %vm382_vm10, %v358_v11, 32.0  ;;  %v144_v16 = vand.u32 127, %v19_v1  ;;  %v141_v1 = vld [vmem:[%s469_s1 + $0x10] sm:$0xff] }
   0xa   :  { %v50_v21 = vmin.f32 %v48_v13, %v49_v19  ;;  %155 = vperm.xlu0 %249, %v17_v2   ;;  %v58_v22 = vsel %vm47_vm1, %v46_v20, inf }
   0xb   :  { %v59_v23 = vmin.f32 %v57_v17, %v58_v22 }
   0xc   :  { %v51_v24 = vrot.slane %v50_v21, 4 }
   0xd   :  { %v60_v25 = vrot.slane %v59_v23, 4 }
   0xe   :  { %v52_v26 = vmin.f32 %v50_v21, %v51_v24  ;;  %158 = vperm.xlu0 %249, %v18_v6  }
   0xf   :  { %v61_v27 = vmin.f32 %v59_v23, %v60_v25 }
  0x10   :  { %v53_v28 = vrot.slane %v52_v26, 2 }
  0x11   :  { %v62_v29 = vrot.slane %v61_v27, 2 }
  0x12   :  { %v54_v30 = vmin.f32 %v52_v26, %v53_v28  ;;  %v142_v26 = vld [vmem:[%s469_s1 + $0x18] sm:$0xff] }
  0x13   :  { %v63_v31 = vmin.f32 %v61_v27, %v62_v29 }
  0x14   :  { %v55_v32 = vrot.slane %v54_v30, 1 }
  0x15   :  { %v64_v33 = vrot.slane %v63_v31, 1 }
  0x16   :  { %v56_v34 = vmin.f32 %v54_v30, %v55_v32 }
  0x17   :  { %v65_v35 = vmin.f32 %v63_v31, %v64_v33 }
  0x18   :  { %vm67_vm11 = vcmp.gt.f32.partialorder %v358_v11, %v56_v34  ;;  %vm66_vm12 = vcmp.gt.f32.partialorder %v342_v7, %v56_v34 }
  0x19   :  { %vm71_vm13 = vmand %vm369_vm9, %vm67_vm11  ;;  %vm68_vm14 = vcmp.gt.f32.partialorder %v342_v7, %v65_v35  ;;  %vm69_vm15 = vcmp.gt.f32.partialorder %v358_v11, %v65_v35 }
  0x1a   :  { %v75_v36 = vsel %vm71_vm13, %v358_v11, 32.0  ;;  %vm72_vm0 = vmand %vm362_vm8, %vm68_vm14 }
  0x1b   :  { %vm73_vm2 = vmand %vm382_vm10, %vm69_vm15  ;;  %v76_v37 = vsel %vm72_vm0, %v342_v7, 32.0  ;;  %v79_v38 = vsel %vm47_vm1, %v75_v36, inf }
  0x1c   :  { %v77_v39 = vsel %vm73_vm2, %v358_v11, 32.0  ;;  %v87_v40 = vsel %vm47_vm1, %v76_v37, inf  ;;  %vm70_vm4 = vmand %vm349_vm5, %vm66_vm12 }
  0x1d   :  { %v88_v41 = vsel %vm47_vm1, %v77_v39, inf  ;;  %v74_v42 = vsel %vm70_vm4, %v342_v7, 32.0 }
  0x1e   :  { %v89_v43 = vmin.f32 %v87_v40, %v88_v41  ;;  %v78_v44 = vsel %vm47_vm1, %v74_v42, inf }
  0x1f   :  { %v80_v45 = vmin.f32 %v78_v44, %v79_v38 }
  0x20   :  { %v90_v46 = vrot.slane %v89_v43, 4 }
  0x21   :  { %v81_v47 = vrot.slane %v80_v45, 4 }
  0x22   :  { %v91_v48 = vmin.f32 %v89_v43, %v90_v46 }
  0x23   :  { %v82_v49 = vmin.f32 %v80_v45, %v81_v47 }
  0x24   :  { %v92_v50 = vrot.slane %v91_v48, 2 }
  0x25   :  { %v83_v51 = vrot.slane %v82_v49, 2 }
  0x26   :  { %v93_v52 = vmin.f32 %v91_v48, %v92_v50 }
  0x27   :  { %v84_v53 = vmin.f32 %v82_v49, %v83_v51 }
  0x28   :  { %v94_v54 = vrot.slane %v93_v52, 1 }
  0x29   :  { %v85_v55 = vrot.slane %v84_v53, 1 }
  0x2a   :  { %v95_v57 = vmin.f32 %v93_v52, %v94_v54 }
  0x2b   :  { %v86_v56 = vmin.f32 %v84_v53, %v85_v55 }
  0x2c   :  { %vm102_vm10 = vcmp.lt.f32.partialorder %v342_v7, %v95_v57  ;;  %vm103_vm12 = vcmp.lt.f32.partialorder %v358_v11, %v95_v57 }
  0x2d   :  { %vm100_vm5 = vcmp.lt.f32.partialorder %v342_v7, %v86_v56  ;;  %vm101_vm6 = vcmp.lt.f32.partialorder %v358_v11, %v86_v56  ;;  %vm106_vm11 = vmand %vm22_vm3, %vm102_vm10 }
  0x2e   :  { %vm104_vm8 = vmand %vm22_vm3, %vm100_vm5  ;;  %v239_v2 = vsel %vm106_vm11, 1.0, %v300_v59  ;;  %v166_v4 = vsel %vm106_vm11, 1, %v299_v3 }
  0x2f   :  { %v164_v58 = vsel %vm104_vm8, 1, %v299_v3  ;;  %v237_v60 = vsel %vm104_vm8, 1.0, %v300_v59  ;;  %vm105_vm9 = vmand %vm25_vm7, %vm101_vm6  ;;  %v124_v7 = vsel %vm47_vm1, %v239_v2, 0.0 }
  0x30   :  { %169 = vperm.xlu1 %250, %v164_v58   ;;  %v238_v61 = vsel %vm105_vm9, 1.0, %v300_v59  ;;  %v165_v62 = vsel %vm105_vm9, 1, %v299_v3  ;;  %v121_v63 = vsel %vm47_vm1, %v237_v60, 0.0  ;;  %vm107_vm13 = vmand %vm25_vm7, %vm103_vm12 }
  0x31   :  { %v122_v0 = vsel %vm47_vm1, %v238_v61, 0.0  ;;  %v240_v9 = vsel %vm107_vm13, 1.0, %v300_v59  ;;  %v167_v5 = vsel %vm107_vm13, 1, %v299_v3  ;;  %v139_v3 = vld [vmem:[%s469_s1] sm:$0xff]  ;;  %s225_s1 = sshll.u32 %s301_s28, 4  ;;  %s226_s1 = int_to_ptr.vmem [resolvable:$true] %s225_s1 }
  0x32   :  { %v123_v6 = vadd.f32 %v122_v0, %v121_v63  ;;  %v126_v12 = vsel %vm47_vm1, %v240_v9, 0.0  ;;  %s251_s29 = scalar_lea.vmem %s226_s1, 128  ;;  %p256_p1 = scmp.lt.s32.totalorder %s226_s1, %s226_s1 }
  0x33   :  { %p252_p0 = scmp.ne.s32.totalorder %s226_s1, %s251_s29  ;;  %p257_p2 = scmp.lt.s32.totalorder %s251_s29, %s251_s29 }
  0x34   :  { %172 = vperm.xlu1 %250, %v165_v62   ;;  %v125_v10 = vadd.f32 %v124_v7, %v123_v6 }
  0x35   :  { %p258_p3 = por %p257_p2, %p256_p1 }
  0x36   :  { %v127_v13 = vadd.f32 %v126_v12, %v125_v10 }
  0x37   :  { %p259_p4 = pnand %p258_p3, %p252_p0 }
  0x38   :  { %175 = vperm.xlu1 %250, %v166_v4   ;;  %128 = vadd.xlane.f32.xlu0 %v127_v13 }
  0x3c   :  { %178 = vperm.xlu1 %250, %v167_v5  }
  0x81   :  { %v150_v11 = vpop.permute.xlu0 %149 }
  0x82   :  { %vm160_vm3 = vcmp.eq.s32.totalorder %v144_v16, %v150_v11 }
  0x85   :  { %v153_v14 = vpop.permute.xlu0 %152 }
  0x86   :  { %vm161_vm7 = vcmp.eq.s32.totalorder %v144_v16, %v153_v14 }
  0x89   :  { %v156_v17 = vpop.permute.xlu0 %155 }
  0x8a   :  { %vm162_vm2 = vcmp.eq.s32.totalorder %v144_v16, %v156_v17 }
  0x8d   :  { %v159_v21 = vpop.permute.xlu0 %158 }
  0x8e   :  { %vm163_vm6 = vcmp.eq.s32.totalorder %v144_v16, %v159_v21 }
  0xaf   :  { %v170_v15 = vpop.permute.xlu1 %169 }
  0xb0   :  { %vm180_vm14 = vcmp.eq.s32.totalorder %v170_v15, 1 }
  0xb1   :  { %vm184_vm0 = vmand %vm160_vm3, %vm180_vm14 }
  0xb2   :  { %v188_v22 = vsel %vm184_vm0, %v139_v3, 0.0 }
  0xb3   :  { %v173_v8 = vpop.permute.xlu1 %172 }
  0xb4   :  { %vm181_vm15 = vcmp.eq.s32.totalorder %v173_v8, 1 }
  0xb5   :  { %vm185_vm1 = vmand %vm161_vm7, %vm181_vm15 }
  0xb6   :  { %v189_v20 = vsel %vm185_vm1, %v140_v18, 0.0 }
  0xb7   :  { %v176_v19 = vpop.permute.xlu1 %175  ;;  %v192_v24 = vadd.f32 %v189_v20, %v188_v22 }
  0xb8   :  { %vm182_vm4 = vcmp.eq.s32.totalorder %v176_v19, 1 }
  0xb9   :  { %vm186_vm5 = vmand %vm162_vm2, %vm182_vm4 }
  0xba   :  { %v190_v23 = vsel %vm186_vm5, %v141_v1, 0.0 }
  0xbb   :  { %v179_v25 = vpop.permute.xlu1 %178  ;;  %v193_v27 = vadd.f32 %v192_v24, %v190_v23 }
  0xbc   :  { %vm183_vm8 = vcmp.eq.s32.totalorder %v179_v25, 1 }
  0xbd   :  { %vm187_vm9 = vmand %vm163_vm6, %vm183_vm8 }
  0xbe   :  { %v191_v28 = vsel %vm187_vm9, %v142_v26, 0.0 }
  0xbf   :  { %v194_v29 = vadd.f32 %v193_v27, %v191_v28 }
  0xc1   :  { %195 = vadd.xlane.f32.xlu1 %v194_v29 }
  0xc5   :  { %v129_v30 = vpop.xlane.xlu0 %128 }
  0xc6   :  { %v130_v31 = vrot.slane %v129_v30, 4 }
  0xc8   :  { %v131_v32 = vadd.f32 %v130_v31, %v129_v30 }
  0xca   :  { %v132_v33 = vrot.slane %v131_v32, 2 }
  0xcc   :  { %v133_v34 = vadd.f32 %v132_v33, %v131_v32 }
  0xce   :  { %v134_v35 = vrot.slane %v133_v34, 1 }
  0xd0   :  { %v135_v36 = vadd.f32 %v134_v35, %v133_v34 }
  0xd2   :  { %241 = vpush %v135_v36 }
 0x103   :  { %s242_s27 = spop %241 }
 0x104   :  { %v137_v37 = vstv %s242_s27 }
 0x105   :  { %138 = vst [vmem:[#allocation4] sm:$0xff] %v137_v37 }
 0x106   :  { %262 = shalt.err (!%p259_p4)
}
 0x107   :  { %s263_s5 = scalar_lea.hbm %s471_s3, 128 }
 0x108   :  { %p264_p5 = scmp.ne.s32.totalorder %s471_s3, %s263_s5  ;;  %p267_p6 = scmp.lt.u32.totalorder %s263_s5, %s471_s3 }
 0x10a   :  { %p269_p7 = pnand %p267_p6, %p264_p5 }
 0x10c   :  { %272 = shalt.err (!%p269_p7)
}
 0x10d   :  { %228 = dma.vmem_to_hbm [thread:$0]  %s226_s1, 128, %s471_s3, [#allocation5]  }
 0x10e   :  { %s302_s14 = smov [#allocation2]  }
 0x10f   :  { %s215_s15 = sshll.u32 %s302_s14, 4  ;;  %s216_s15 = int_to_ptr.vmem [resolvable:$true] %s215_s15 }
 0x110   :  { %s273_s16 = scalar_lea.vmem %s216_s15, 128  ;;  %p278_p9 = scmp.lt.s32.totalorder %s216_s15, %s216_s15 }
 0x111   :  { %p274_p8 = scmp.ne.s32.totalorder %s216_s15, %s273_s16  ;;  %p279_p10 = scmp.lt.s32.totalorder %s273_s16, %s273_s16 }
 0x113   :  { %p280_p11 = por %p279_p10, %p278_p9 }
 0x115   :  { %p281_p12 = pnand %p280_p11, %p274_p8 }
 0x14e   :  { %v196_v38 = vpop.xlane.xlu1 %195 }
 0x14f   :  { %v197_v39 = vrot.slane %v196_v38, 4 }
 0x151   :  { %v198_v40 = vadd.f32 %v197_v39, %v196_v38 }
 0x153   :  { %v199_v41 = vrot.slane %v198_v40, 2 }
 0x155   :  { %v200_v42 = vadd.f32 %v199_v41, %v198_v40 }
 0x157   :  { %v201_v43 = vrot.slane %v200_v42, 1 }
 0x159   :  { %v202_v44 = vadd.f32 %v201_v43, %v200_v42 }
 0x15b   :  { %243 = vpush %v202_v44 }
 0x18c   :  { %s244_s12 = spop %243 }
 0x18d   :  { %s204_s13 = ssub.f32 0.0, %s244_s12 }
 0x18f   :  { %v206_v45 = vstv %s204_s13 }
 0x190   :  { %208 = vst [vmem:[#allocation2] sm:$0xff] %v206_v45 }
 0x191   :  { %284 = shalt.err (!%p281_p12)
}
 0x192   :  { %s285_s18 = scalar_lea.hbm %s470_s2, 128 }
 0x193   :  { %p286_p13 = scmp.ne.s32.totalorder %s470_s2, %s285_s18  ;;  %p289_p0 = scmp.lt.u32.totalorder %s285_s18, %s470_s2 }
 0x195   :  { %p291_p1 = pnand %p289_p0, %p286_p13 }
 0x197   :  { %294 = shalt.err (!%p291_p1)
}
 0x198   :  { %218 = dma.vmem_to_hbm [thread:$0]  %s216_s15, 128, %s470_s2, [#allocation3]  }
 0x199   :  { %295 = dma.done.wait [#allocation3], 128  }
 0x19a   :  { %296 = vsyncadd [#allocation3], 4294967168 }
 0x19b   :  { %297 = dma.done.wait [#allocation5], 128  }
 0x19c   :  { %298 = vsyncadd [#allocation5], 4294967168 }
 0x19d   :  { %235 = vsyncpa [#allocation3], 1 }
 0x19e   :  { %236 = vsyncpa [#allocation5], 1 }

</bundles_post_ra>
